<compile_context>
chip_gen: v7x
topology: tpu7x:2x2x1
jax: 0.10.0
libtpu: 0.0.40
codegen_flags: <defaults>
</compile_context>

<pallas_src>
import math
import functools

import jax
import jax.numpy as jnp
from jax import lax
from jax.experimental import pallas as pl
from jax.experimental.pallas import tpu as pltpu


def _mha_skip_kernel(x_ref, wqkv_ref, wout_ref, o_ref, *,
                     n_heads, key_dim, val_dim, norm_factor):
    """One grid step = BB batch elements. Entire MHA + residual in VMEM."""
    bb, S, D = x_ref.shape
    H, Dk, Dv = n_heads, key_dim, val_dim
    off_k = H * Dk          # column offset of the K block in the fused qkv
    off_v = 2 * H * Dk      # column offset of the V block

    x_f32 = x_ref[...].astype(jnp.float32)               # (BB, S, D) residual
    x_bf = x_f32.reshape(bb * S, D).astype(jnp.bfloat16)

    # Single fused projection for all heads and all BB batches:
    #   (BB*S, D) @ (D, H*Dk + H*Dk + H*Dv) -> f32 accumulate.
    qkv = jnp.dot(x_bf, wqkv_ref[...], preferred_element_type=jnp.float32)

    wout = wout_ref[...]                                  # (H*Dv, E), bf16

    for b in range(bb):                                   # static, unrolled
        r0 = b * S
        heads = []
        for h in range(H):                                # static, unrolled
            q = qkv[r0:r0 + S, h * Dk:(h + 1) * Dk]                    # (S, Dk)
            k = qkv[r0:r0 + S, off_k + h * Dk: off_k + (h + 1) * Dk]   # (S, Dk)
            v = qkv[r0:r0 + S, off_v + h * Dv: off_v + (h + 1) * Dv]   # (S, Dv)

            # q @ k.T without an explicit transpose (fold into dot_general).
            compat = norm_factor * lax.dot_general(
                q, k, (((1,), (1,)), ((), ())),
                preferred_element_type=jnp.float32)                     # (S, S)

            # softmax over the key axis (f32 throughout).
            m = jnp.max(compat, axis=-1, keepdims=True)
            e = jnp.exp(compat - m)
            attn = e * pl.reciprocal(jnp.sum(e, axis=-1, keepdims=True),
                                     approx=True)
            heads.append(jnp.dot(attn, v,
                                 preferred_element_type=jnp.float32))   # (S, Dv)

        # Fused output projection: concat over heads == concat @ W_out.view(-1,E)
        heads_concat = jnp.concatenate(heads, axis=-1)                  # (S, H*Dv)
        out_b = x_f32[b] + jnp.dot(heads_concat.astype(jnp.bfloat16), wout,
                                   preferred_element_type=jnp.float32)  # (S, E)
        o_ref[b] = out_b.astype(o_ref.dtype)


def skip_connection_mha(x, w_query, w_key, w_val, w_out):
    """x: (B, S, D) float32. Returns (B, S, E) with E == D."""
    B, S, D = x.shape
    H, _, Dk = w_query.shape
    Dv = w_val.shape[-1]
    E = w_out.shape[-1]
    assert E == D, "SkipConnection requires embed_dim == input_dim"
    norm_factor = 1.0 / math.sqrt(Dk)

    # Wrapper-side weight fusion (trace-time XLA ops, free at kernel runtime):
    #   per-head (H, D, Dk) -> (D, H*Dk), concatenated as [Q | K | V].
    wq_f = jnp.transpose(w_query, (1, 0, 2)).reshape(D, H * Dk)
    wk_f = jnp.transpose(w_key, (1, 0, 2)).reshape(D, H * Dk)
    wv_f = jnp.transpose(w_val, (1, 0, 2)).reshape(D, H * Dv)
    w_qkv = jnp.concatenate([wq_f, wk_f, wv_f], axis=1).astype(jnp.bfloat16)
    w_out_flat = w_out.reshape(H * Dv, E).astype(jnp.bfloat16)
    qkv_cols = 2 * H * Dk + H * Dv

    # Grid: 2-way parallel axis when B is even (one TC each on v7x), with the
    # remaining B//2 batches fused inside a single grid step (so v5e/v6e pay at
    # most 2 * ~0.35us of per-step overhead). Odd B falls back to grid=(B,).
    G = 2 if (B % 2 == 0 and B >= 2) else B
    BB = B // G

    kernel = functools.partial(_mha_skip_kernel, n_heads=H, key_dim=Dk,
                               val_dim=Dv, norm_factor=norm_factor)

    return pl.pallas_call(
        kernel,
        out_shape=jax.ShapeDtypeStruct((B, S, E), x.dtype),
        grid_spec=pltpu.PrefetchScalarGridSpec(
            num_scalar_prefetch=0,
            grid=(G,),
            in_specs=[
                pl.BlockSpec((BB, S, D), lambda g: (g, 0, 0)),   # x tile
                pl.BlockSpec((D, qkv_cols), lambda g: (0, 0)),   # fused W_qkv
                pl.BlockSpec((H * Dv, E), lambda g: (0, 0)),     # W_out flat
            ],
            out_specs=pl.BlockSpec((BB, S, E), lambda g: (g, 0, 0)),
        ),
        compiler_params=pltpu.CompilerParams(
            dimension_semantics=("parallel",)),
    )(x, w_qkv, w_out_flat)


def _reference(x, w_query, w_key, w_val, w_out):
    """Plain-JAX f32 reference mirroring the PyTorch forward."""
    H, D, Dk = w_query.shape
    norm = 1.0 / math.sqrt(Dk)
    Q = jnp.einsum("bsd,hde->hbse", x, w_query)
    K = jnp.einsum("bsd,hde->hbse", x, w_key)
    V = jnp.einsum("bsd,hde->hbse", x, w_val)
    compat = norm * jnp.einsum("hbqe,hbke->hbqk", Q, K)
    attn = jax.nn.softmax(compat, axis=-1)
    heads = jnp.einsum("hbqk,hbke->hbqe", attn, V)            # (H, B, S, Dv)
    out = jnp.einsum("hbqe,heo->bqo", heads, w_out)           # (B, S, E)
    return x + out


if __name__ == "__main__":
    # batch=2, graph_size(seq)=8, input_dim=embed_dim=32, n_heads=4
    # -> key_dim = val_dim = 8.
    B, S, D = 2, 8, 32
    H = 4
    E = D
    Dk = Dv = E // H

    key = jax.random.PRNGKey(0)
    kx, kq, kk, kv, ko = jax.random.split(key, 5)

    x = jax.random.normal(kx, (B, S, D), dtype=jnp.float32)

    # Mimic PyTorch init: uniform(-stdv, stdv), stdv = 1/sqrt(size(-1)).
    def init(k, shape):
        stdv = 1.0 / math.sqrt(shape[-1])
        return jax.random.uniform(k, shape, jnp.float32, -stdv, stdv)

    w_query = init(kq, (H, D, Dk))
    w_key   = init(kk, (H, D, Dk))
    w_val   = init(kv, (H, D, Dv))
    w_out   = init(ko, (H, Dv, E))

    out = skip_connection_mha(x, w_query, w_key, w_val, w_out)
    out = jax.block_until_ready(out)

    ref = _reference(x, w_query, w_key, w_val, w_out)
    assert out.shape == (B, S, E)
    # bf16 MXU operands + approx reciprocal -> loosened tolerance vs f32 ref.
    assert jnp.allclose(out, ref, atol=5e-2, rtol=5e-2), "mismatch vs reference"

    print("KERNEL_OK")
</pallas_src>

<mosaic_0001>
module attributes {stable_mosaic.version = 11 : i64} {
  func.func @_mha_skip_kernel(%arg0: i32, %arg1: memref<1x8x32xf32, #tpu.memory_space<vmem>>, %arg2: memref<32x96xbf16, #tpu.memory_space<vmem>>, %arg3: memref<32x32xbf16, #tpu.memory_space<vmem>>, %arg4: memref<1x8x32xf32, #tpu.memory_space<vmem>>) attributes {dimension_semantics = [#tpu.dimension_semantics<parallel>], iteration_bounds = array<i64: 2>, scalar_prefetch = 0 : i64, scratch_operands = 0 : i64, tpu.core_type = #tpu.core_type<tc>, window_params = [{transform_indices = @transform_0, window_bounds = array<i64: 1, 8, 32>}, {pipeline_mode = #tpu.pipeline_mode<synchronous>, transform_indices = @transform_1, window_bounds = array<i64: 32, 96>}, {pipeline_mode = #tpu.pipeline_mode<synchronous>, transform_indices = @transform_2, window_bounds = array<i64: 32, 32>}, {transform_indices = @transform_3, window_bounds = array<i64: 1, 8, 32>}]} {
    %c0 = arith.constant 0 : index
    %c0_0 = arith.constant 0 : index
    %c0_1 = arith.constant 0 : index
    %0 = vector.load %arg1[%c0, %c0_0, %c0_1] : memref<1x8x32xf32, #tpu.memory_space<vmem>>, vector<1x8x32xf32>
    %1 = vector.shape_cast %0 : vector<1x8x32xf32> to vector<8x32xf32>
    %2 = arith.truncf %1 : vector<8x32xf32> to vector<8x32xbf16>
    %c0_2 = arith.constant 0 : index
    %c0_3 = arith.constant 0 : index
    %3 = vector.load %arg2[%c0_2, %c0_3] : memref<32x96xbf16, #tpu.memory_space<vmem>>, vector<32x96xbf16>
    %cst = arith.constant dense<0.000000e+00> : vector<8x96xf32>
    %4 = tpu.matmul %2, %3, %cst {dimension_numbers = #tpu.dot_dimension_numbers<[1], [0], [0], [1], [0, 0, 1, 1], [], []>} : vector<8x32xbf16>, vector<32x96xbf16>, vector<8x96xf32> -> vector<8x96xf32>
    %c0_4 = arith.constant 0 : index
    %c0_5 = arith.constant 0 : index
    %5 = vector.load %arg3[%c0_4, %c0_5] : memref<32x32xbf16, #tpu.memory_space<vmem>>, vector<32x32xbf16>
    %6 = vector.extract_strided_slice %4 {offsets = [0, 0], sizes = [8, 8], strides = [1, 1]} : vector<8x96xf32> to vector<8x8xf32>
    %7 = vector.extract_strided_slice %4 {offsets = [0, 32], sizes = [8, 8], strides = [1, 1]} : vector<8x96xf32> to vector<8x8xf32>
    %8 = vector.extract_strided_slice %4 {offsets = [0, 64], sizes = [8, 8], strides = [1, 1]} : vector<8x96xf32> to vector<8x8xf32>
    %cst_6 = arith.constant dense<0.000000e+00> : vector<8x8xf32>
    %9 = tpu.matmul %6, %7, %cst_6 {dimension_numbers = #tpu.dot_dimension_numbers<[1], [1], [0], [0], [0, 0, 1, 0], [], []>} : vector<8x8xf32>, vector<8x8xf32>, vector<8x8xf32> -> vector<8x8xf32>
    %cst_7 = arith.constant 0.353553385 : f32
    %10 = vector.broadcast %cst_7 : f32 to vector<8x8xf32>
    %11 = arith.mulf %10, %9 : vector<8x8xf32>
    %cst_8 = arith.constant dense<0xFF800000> : vector<8xf32>
    %12 = vector.multi_reduction <maximumf>, %11, %cst_8 [1] : vector<8x8xf32> to vector<8xf32>
    %13 = vector.shape_cast %12 : vector<8xf32> to vector<8x1xf32>
    %14 = vector.broadcast %13 : vector<8x1xf32> to vector<8x8xf32>
    %15 = arith.subf %11, %14 : vector<8x8xf32>
    %16 = math.exp %15 : vector<8x8xf32>
    %cst_9 = arith.constant dense<0.000000e+00> : vector<8xf32>
    %17 = vector.multi_reduction <add>, %16, %cst_9 [1] : vector<8x8xf32> to vector<8xf32>
    %18 = vector.shape_cast %17 : vector<8xf32> to vector<8x1xf32>
    %19 = tpu.reciprocal %18 {approx = true} : vector<8x1xf32> -> vector<8x1xf32>
    %20 = vector.broadcast %19 : vector<8x1xf32> to vector<8x8xf32>
    %21 = arith.mulf %16, %20 : vector<8x8xf32>
    %cst_10 = arith.constant dense<0.000000e+00> : vector<8x8xf32>
    %22 = tpu.matmul %21, %8, %cst_10 {dimension_numbers = #tpu.dot_dimension_numbers<[1], [0], [0], [1], [0, 0, 1, 1], [], []>} : vector<8x8xf32>, vector<8x8xf32>, vector<8x8xf32> -> vector<8x8xf32>
    %23 = vector.extract_strided_slice %4 {offsets = [0, 8], sizes = [8, 8], strides = [1, 1]} : vector<8x96xf32> to vector<8x8xf32>
    %24 = vector.extract_strided_slice %4 {offsets = [0, 40], sizes = [8, 8], strides = [1, 1]} : vector<8x96xf32> to vector<8x8xf32>
    %25 = vector.extract_strided_slice %4 {offsets = [0, 72], sizes = [8, 8], strides = [1, 1]} : vector<8x96xf32> to vector<8x8xf32>
    %cst_11 = arith.constant dense<0.000000e+00> : vector<8x8xf32>
    %26 = tpu.matmul %23, %24, %cst_11 {dimension_numbers = #tpu.dot_dimension_numbers<[1], [1], [0], [0], [0, 0, 1, 0], [], []>} : vector<8x8xf32>, vector<8x8xf32>, vector<8x8xf32> -> vector<8x8xf32>
    %cst_12 = arith.constant 0.353553385 : f32
    %27 = vector.broadcast %cst_12 : f32 to vector<8x8xf32>
    %28 = arith.mulf %27, %26 : vector<8x8xf32>
    %cst_13 = arith.constant dense<0xFF800000> : vector<8xf32>
    %29 = vector.multi_reduction <maximumf>, %28, %cst_13 [1] : vector<8x8xf32> to vector<8xf32>
    %30 = vector.shape_cast %29 : vector<8xf32> to vector<8x1xf32>
    %31 = vector.broadcast %30 : vector<8x1xf32> to vector<8x8xf32>
    %32 = arith.subf %28, %31 : vector<8x8xf32>
    %33 = math.exp %32 : vector<8x8xf32>
    %cst_14 = arith.constant dense<0.000000e+00> : vector<8xf32>
    %34 = vector.multi_reduction <add>, %33, %cst_14 [1] : vector<8x8xf32> to vector<8xf32>
    %35 = vector.shape_cast %34 : vector<8xf32> to vector<8x1xf32>
    %36 = tpu.reciprocal %35 {approx = true} : vector<8x1xf32> -> vector<8x1xf32>
    %37 = vector.broadcast %36 : vector<8x1xf32> to vector<8x8xf32>
    %38 = arith.mulf %33, %37 : vector<8x8xf32>
    %cst_15 = arith.constant dense<0.000000e+00> : vector<8x8xf32>
    %39 = tpu.matmul %38, %25, %cst_15 {dimension_numbers = #tpu.dot_dimension_numbers<[1], [0], [0], [1], [0, 0, 1, 1], [], []>} : vector<8x8xf32>, vector<8x8xf32>, vector<8x8xf32> -> vector<8x8xf32>
    %40 = vector.extract_strided_slice %4 {offsets = [0, 16], sizes = [8, 8], strides = [1, 1]} : vector<8x96xf32> to vector<8x8xf32>
    %41 = vector.extract_strided_slice %4 {offsets = [0, 48], sizes = [8, 8], strides = [1, 1]} : vector<8x96xf32> to vector<8x8xf32>
    %42 = vector.extract_strided_slice %4 {offsets = [0, 80], sizes = [8, 8], strides = [1, 1]} : vector<8x96xf32> to vector<8x8xf32>
    %cst_16 = arith.constant dense<0.000000e+00> : vector<8x8xf32>
    %43 = tpu.matmul %40, %41, %cst_16 {dimension_numbers = #tpu.dot_dimension_numbers<[1], [1], [0], [0], [0, 0, 1, 0], [], []>} : vector<8x8xf32>, vector<8x8xf32>, vector<8x8xf32> -> vector<8x8xf32>
    %cst_17 = arith.constant 0.353553385 : f32
    %44 = vector.broadcast %cst_17 : f32 to vector<8x8xf32>
    %45 = arith.mulf %44, %43 : vector<8x8xf32>
    %cst_18 = arith.constant dense<0xFF800000> : vector<8xf32>
    %46 = vector.multi_reduction <maximumf>, %45, %cst_18 [1] : vector<8x8xf32> to vector<8xf32>
    %47 = vector.shape_cast %46 : vector<8xf32> to vector<8x1xf32>
    %48 = vector.broadcast %47 : vector<8x1xf32> to vector<8x8xf32>
    %49 = arith.subf %45, %48 : vector<8x8xf32>
    %50 = math.exp %49 : vector<8x8xf32>
    %cst_19 = arith.constant dense<0.000000e+00> : vector<8xf32>
    %51 = vector.multi_reduction <add>, %50, %cst_19 [1] : vector<8x8xf32> to vector<8xf32>
    %52 = vector.shape_cast %51 : vector<8xf32> to vector<8x1xf32>
    %53 = tpu.reciprocal %52 {approx = true} : vector<8x1xf32> -> vector<8x1xf32>
    %54 = vector.broadcast %53 : vector<8x1xf32> to vector<8x8xf32>
    %55 = arith.mulf %50, %54 : vector<8x8xf32>
    %cst_20 = arith.constant dense<0.000000e+00> : vector<8x8xf32>
    %56 = tpu.matmul %55, %42, %cst_20 {dimension_numbers = #tpu.dot_dimension_numbers<[1], [0], [0], [1], [0, 0, 1, 1], [], []>} : vector<8x8xf32>, vector<8x8xf32>, vector<8x8xf32> -> vector<8x8xf32>
    %57 = vector.extract_strided_slice %4 {offsets = [0, 24], sizes = [8, 8], strides = [1, 1]} : vector<8x96xf32> to vector<8x8xf32>
    %58 = vector.extract_strided_slice %4 {offsets = [0, 56], sizes = [8, 8], strides = [1, 1]} : vector<8x96xf32> to vector<8x8xf32>
    %59 = vector.extract_strided_slice %4 {offsets = [0, 88], sizes = [8, 8], strides = [1, 1]} : vector<8x96xf32> to vector<8x8xf32>
    %cst_21 = arith.constant dense<0.000000e+00> : vector<8x8xf32>
    %60 = tpu.matmul %57, %58, %cst_21 {dimension_numbers = #tpu.dot_dimension_numbers<[1], [1], [0], [0], [0, 0, 1, 0], [], []>} : vector<8x8xf32>, vector<8x8xf32>, vector<8x8xf32> -> vector<8x8xf32>
    %cst_22 = arith.constant 0.353553385 : f32
    %61 = vector.broadcast %cst_22 : f32 to vector<8x8xf32>
    %62 = arith.mulf %61, %60 : vector<8x8xf32>
    %cst_23 = arith.constant dense<0xFF800000> : vector<8xf32>
    %63 = vector.multi_reduction <maximumf>, %62, %cst_23 [1] : vector<8x8xf32> to vector<8xf32>
    %64 = vector.shape_cast %63 : vector<8xf32> to vector<8x1xf32>
    %65 = vector.broadcast %64 : vector<8x1xf32> to vector<8x8xf32>
    %66 = arith.subf %62, %65 : vector<8x8xf32>
    %67 = math.exp %66 : vector<8x8xf32>
    %cst_24 = arith.constant dense<0.000000e+00> : vector<8xf32>
    %68 = vector.multi_reduction <add>, %67, %cst_24 [1] : vector<8x8xf32> to vector<8xf32>
    %69 = vector.shape_cast %68 : vector<8xf32> to vector<8x1xf32>
    %70 = tpu.reciprocal %69 {approx = true} : vector<8x1xf32> -> vector<8x1xf32>
    %71 = vector.broadcast %70 : vector<8x1xf32> to vector<8x8xf32>
    %72 = arith.mulf %67, %71 : vector<8x8xf32>
    %cst_25 = arith.constant dense<0.000000e+00> : vector<8x8xf32>
    %73 = tpu.matmul %72, %59, %cst_25 {dimension_numbers = #tpu.dot_dimension_numbers<[1], [0], [0], [1], [0, 0, 1, 1], [], []>} : vector<8x8xf32>, vector<8x8xf32>, vector<8x8xf32> -> vector<8x8xf32>
    %74 = tpu.concatenate %22, %39, %56, %73 in 1 : vector<8x8xf32>, vector<8x8xf32>, vector<8x8xf32>, vector<8x8xf32> -> vector<8x32xf32>
    %75 = vector.shape_cast %0 : vector<1x8x32xf32> to vector<8x32xf32>
    %76 = arith.truncf %74 : vector<8x32xf32> to vector<8x32xbf16>
    %cst_26 = arith.constant dense<0.000000e+00> : vector<8x32xf32>
    %77 = tpu.matmul %76, %5, %cst_26 {dimension_numbers = #tpu.dot_dimension_numbers<[1], [0], [0], [1], [0, 0, 1, 1], [], []>} : vector<8x32xbf16>, vector<32x32xbf16>, vector<8x32xf32> -> vector<8x32xf32>
    %78 = arith.addf %75, %77 : vector<8x32xf32>
    %c0_27 = arith.constant 0 : index
    %c0_28 = arith.constant 0 : index
    %c0_29 = arith.constant 0 : index
    %79 = vector.load %arg4[%c0_27, %c0_28, %c0_29] : memref<1x8x32xf32, #tpu.memory_space<vmem>>, vector<1x8x32xf32>
    %80 = vector.shape_cast %79 : vector<1x8x32xf32> to vector<8x32xf32>
    %81 = vector.shape_cast %78 : vector<8x32xf32> to vector<1x8x32xf32>
    tpu.vector_store %arg4[%c0_27, %c0_28, %c0_29], %81 {strides = array<i32>} : memref<1x8x32xf32, #tpu.memory_space<vmem>>, vector<1x8x32xf32>,
    return
  }
  func.func @transform_0(%arg0: i32) -> (i32, i32, i32) {
    %c0_i32 = arith.constant 0 : i32
    %c0_i32_0 = arith.constant 0 : i32
    %c0_i32_1 = arith.constant 0 : i32
    return %arg0, %c0_i32, %c0_i32_0 : i32, i32, i32
  }
  func.func @transform_1(%arg0: i32) -> (i32, i32) {
    %c0_i32 = arith.constant 0 : i32
    %c0_i32_0 = arith.constant 0 : i32
    %c0_i32_1 = arith.constant 0 : i32
    return %c0_i32, %c0_i32_0 : i32, i32
  }
  func.func @transform_2(%arg0: i32) -> (i32, i32) {
    %c0_i32 = arith.constant 0 : i32
    %c0_i32_0 = arith.constant 0 : i32
    %c0_i32_1 = arith.constant 0 : i32
    return %c0_i32, %c0_i32_0 : i32, i32
  }
  func.func @transform_3(%arg0: i32) -> (i32, i32, i32) {
    %c0_i32 = arith.constant 0 : i32
    %c0_i32_0 = arith.constant 0 : i32
    %c0_i32_1 = arith.constant 0 : i32
    return %arg0, %c0_i32, %c0_i32_0 : i32, i32, i32
  }
}

</mosaic_0001>

<bundles_post_ra>
// kernel: tpu_custom_call.1
= control target key start
LH: loop header
LB: loop body
LE: loop exit
PB: predicated region body
PF: predicated region fallthrough
CT: control target
= control target key end

     0   :  { %8 = vsyncpa [#allocation3], 0  ;;  %s1852_s0 = inlined_call_operand.hbm [shape: f32[2,8,32], index: 0, kind: input, shape index: {}]   ;;  %s1853_s1 = inlined_call_operand.hbm [shape: bf16[32,96], index: 1, kind: input, shape index: {}]   ;;  %s1854_s2 = inlined_call_operand.hbm [shape: bf16[32,32], index: 2, kind: input, shape index: {}]   ;;  %s1855_s3 = inlined_call_operand.hbm [shape: f32[2,8,32], index: 3, kind: output, shape index: {}]  }
   0x1   :  { %10 = vsyncpa [#allocation3 + $0x1], 0 }
   0x2   :  { %11 = vsyncpa [#allocation6], 0 }
   0x3   :  { %12 = vsyncpa [#allocation4], 0 }
   0x4   :  { %14 = vsyncpa [#allocation4 + $0x1], 0  ;;  %s1541_s12 = smov 0   ;;  %s1543_s13 = smov 0  }
   0x5   :  { %s1545_s14 = smov 0   ;;  %s1547_s15 = smov 0  }
   0x6 LB: > { %s1562_s16 = sadd.s32 4294967295, %s1497_s15   ;;  %s1124_s17 = sadd.s32 4294967294, %s1497_s15   ;;  %s1497_s15 = sphi %s1547_s15, %s1875_s15   ;;  %s1493_s14 = sphi %s1545_s14, %s1874_s14   ;;  %s1489_s13 = sphi %s1543_s13, %s1873_s13   ;;  %s1485_s12 = sphi %s1541_s12, %s1872_s12  }
   0x7   : > { %p40_p0 = scmp.ne.s32.totalorder %s1489_s13, %s1485_s12  ;;  %p1856_p1 = scmp.eq.s32.totalorder %s1562_s16, 0 }
   0x8   : > { %p112_p3 = scmp.eq.s32.totalorder %s1124_s17, 1  ;;  %p1125_p5 = scmp.ge.s32.totalorder %s1497_s15, 1 }
   0x9   : > { %p1571_p4 = por %p1856_p1, %p40_p0  ;;  %p119_p7 = scmp.lt.s32.totalorder %s1497_s15, 3 }
   0xa   : > { %p1576_p6 = por %p112_p3, %p40_p0  ;;  %s1499_s21 = smov [#allocation5]  }
   0xb   : > { %s1859_s18 = scalar_select %p1571_p4, 1, 0 }
   0xc   : > { %s1860_s19 = scalar_select %p1576_p6, 1, 0 }
   0xd   : > { %p1581_p8 = pnand %p1125_p5, %p119_p7  ;;  %s131_s22 = sshll.u32 %s1499_s21, 4  ;;  %s1585_s22 = int_to_ptr.vmem [resolvable:$true] %s131_s22 }
   0xe   : > { %s1500_s24 = smov [#allocation7]   ;;  %s1341_s28 = scalar_lea.hbm %s1853_s1, 256 }
   0xf   : > { %p1248_p9 = pneg %p1581_p8  ;;  %s144_s25 = sshll.u32 %s1500_s24, 4  ;;  %s1596_s25 = int_to_ptr.vmem [resolvable:$true] %s144_s25 }
  0x10   : > { %p1342_p12 = scmp.ne.s32.totalorder %s1853_s1, %s1341_s28  ;;  %p1348_p5 = scmp.lt.u32.totalorder %s1341_s28, %s1853_s1 }
  0x11   : > { %p1592_p11 = pnand %p1248_p9, %p1856_p1 }
  0x13   : > { %p1343_p13 = pneg %p1592_p11 }
  0x15   : > { %p1344_p0 = pnand %p1343_p13, %p1342_p12 }
  0x17   : > { %p1345_p3 = pneg %p1344_p0 }
  0x19   : > { %p1350_p7 = pnand %p1348_p5, %p1345_p3 }
  0x1b   : > { %1353 = shalt.err (!%p1350_p7)
}
  0x1c   : > { %s1354_s6 = scalar_lea.vmem %s1585_s22, 256  ;;  %p1362_p2 = scmp.lt.s32.totalorder %s1585_s22, %s1585_s22 }
  0x1d   : > { %p1355_p9 = scmp.ne.s32.totalorder %s1585_s22, %s1354_s6  ;;  %p1363_p12 = scmp.lt.s32.totalorder %s1354_s6, %s1354_s6 }
  0x1f   : > { %p1357_p10 = pnand %p1355_p9, %p1343_p13  ;;  %p1364_p0 = por %p1363_p12, %p1362_p2 }
  0x21   : > { %p1358_p1 = pneg %p1357_p10 }
  0x23   : > { %p1365_p6 = pnand %p1364_p0, %p1358_p1 }
  0x25   : > { %1368 = shalt.err (!%p1365_p6)
}
  0x26   : > { %s1501_s7 = smov 64   ;;  %s1502_s8 = smov 4  }
  0x27   : > { %1251 = dma.hbm_to_vmem [thread:$0]  (!%p1592_p11), %s1853_s1, 256, %s1585_s22, [#allocation6], %s1501_s7, %s1501_s7, %s1502_s8  }
  0x28   : > { %s1369_s21 = scalar_lea.hbm %s1854_s2, 256 }
  0x29   : > { %p1370_p2 = scmp.ne.s32.totalorder %s1854_s2, %s1369_s21  ;;  %p1376_p10 = scmp.lt.u32.totalorder %s1369_s21, %s1854_s2 }
  0x2b   : > { %p1372_p1 = pnand %p1370_p2, %p1343_p13 }
  0x2d   : > { %p1373_p6 = pneg %p1372_p1 }
  0x2f   : > { %p1378_p3 = pnand %p1376_p10, %p1373_p6 }
  0x31   : > { %1381 = shalt.err (!%p1378_p3)
}
  0x32   : > { %s1382_s22 = scalar_lea.vmem %s1596_s25, 256  ;;  %p1390_p12 = scmp.lt.s32.totalorder %s1596_s25, %s1596_s25 }
  0x33   : > { %p1383_p5 = scmp.ne.s32.totalorder %s1596_s25, %s1382_s22  ;;  %p1391_p0 = scmp.lt.s32.totalorder %s1382_s22, %s1382_s22 }
  0x35   : > { %p1385_p7 = pnand %p1383_p5, %p1343_p13  ;;  %p1392_p2 = por %p1391_p0, %p1390_p12 }
  0x37   : > { %p1386_p9 = pneg %p1385_p7 }
  0x39   : > { %p1393_p1 = pnand %p1392_p2, %p1386_p9 }
  0x3b   : > { %1396 = shalt.err (!%p1393_p1)
}
  0x3c   : > { %1254 = dma.hbm_to_vmem [thread:$0]  (!%p1592_p11), %s1854_s2, 256, %s1596_s25, [#allocation6], %s1501_s7, %s1501_s7, %s1502_s8  }
  0x3d   : > { %s1651_s4 = sadd.s32 1, %s1497_s15   ;;  %s27_s23 = sadd.s32 1, %s1493_s14 }
  0x3e   : > { %s24_s5 = ssub.s32 %s1497_s15, %s1651_s4  ;;  %p34_p13 = scmp.ne.s32.totalorder %s1493_s14, %s1489_s13 }
  0x3f   : > { %p25_p6 = scmp.eq.s32.totalorder %s24_s5, 0  ;;  %p35_p10 = scmp.eq.s32.totalorder %s1497_s15, 0 }
  0x40   : > { %p1863_p3 = scmp.eq.s32.totalorder %s1562_s16, 1  ;;  %p1265_p7 = scmp.lt.s32.totalorder %s1497_s15, 2 }
  0x41   : > { %s1667_s9 = scalar_select %p25_p6, %s1493_s14, %s27_s23  }
  0x42   : > { %p1661_p5 = por %p1863_p3, %p34_p13  ;;  %p36_p9 = por %p35_p10, %p34_p13 }
  0x43   : > { %s158_s10 = sand.u32 1, %s1493_s14   ;;  %s1130_s25 = sshll.u32 %s1497_s15, 7 }
  0x44   : > { %s1864_s6 = scalar_select %p1661_p5, 1, 0 }
  0x45   : > { %s1129_s11 = sshll.u32 %s158_s10, 3  ;;  %s1674_s17 = scalar_lea.hbm %s1852_s0, %s1130_s25 }
  0x46   : > { %s162_s21 = scalar_lea.vmem [#allocation2], %s1129_s11  ;;  %p1678_p11 = pnand %p1265_p7, %p36_p9 }
  0x47   : > { %s169_s24 = sshll.u32 %s162_s21, 4  ;;  %s159_s27 = scalar_lea.sflag [#allocation3], %s158_s10  ;;  %s1676_s24 = int_to_ptr.vmem [resolvable:$true] %s169_s24 }
  0x48   : > { %s1397_s28 = scalar_lea.hbm %s1674_s17, 128  ;;  %p1399_p0 = pneg %p1678_p11 }
  0x49   : > { %p1398_p12 = scmp.ne.s32.totalorder %s1674_s17, %s1397_s28  ;;  %s1402_s30 = scalar_lea.hbm %s1852_s0, 256 }
  0x4a   : > { %p1403_p13 = scmp.lt.u32.totalorder %s1674_s17, %s1852_s0  ;;  %p1404_p6 = scmp.lt.u32.totalorder %s1402_s30, %s1397_s28 }
  0x4b   : > { %p1400_p2 = pnand %p1399_p0, %p1398_p12  ;;  %p1406_p3 = scmp.lt.u32.totalorder %s1397_s28, %s1674_s17 }
  0x4c   : > { %p1405_p10 = por %p1404_p6, %p1403_p13 }
  0x4d   : > { %p1401_p1 = pneg %p1400_p2 }
  0x4e   : > { %p1407_p7 = por %p1406_p3, %p1405_p10 }
  0x50   : > { %p1408_p9 = pnand %p1407_p7, %p1401_p1 }
  0x52   : > { %1411 = shalt.err (!%p1408_p9)
}
  0x53   : > { %s1412_s10 = scalar_lea.vmem %s1676_s24, 128  ;;  %s1503_s11 = smov [#allocation2]  }
  0x54   : > { %p1413_p12 = scmp.ne.s32.totalorder %s1676_s24, %s1412_s10  ;;  %s1417_s25 = sshll.u32 %s1503_s11, 4  ;;  %s1418_s25 = int_to_ptr.vmem [resolvable:$false] %s1417_s25 }
  0x55   : > { %s1419_s7 = scalar_lea.vmem %s1418_s25, 256  ;;  %p1420_p4 = scmp.lt.s32.totalorder %s1676_s24, %s1418_s25 }
  0x56   : > { %p1415_p2 = pnand %p1413_p12, %p1399_p0  ;;  %p1421_p13 = scmp.lt.s32.totalorder %s1419_s7, %s1412_s10 }
  0x58   : > { %p1416_p5 = pneg %p1415_p2  ;;  %p1422_p6 = por %p1421_p13, %p1420_p4 }
  0x5a   : > { %p1423_p10 = pnand %p1422_p6, %p1416_p5 }
  0x5c   : > { %1426 = shalt.err (!%p1423_p10)
}
  0x5d   : > { %1258 = dma.hbm_to_vmem [thread:$0]  (!%p1678_p11), %s1674_s17, 128, %s1676_s24, %s159_s27  }
  0x5e   : > { %178 = sbr.rel (%p1581_p8) target bundleno = 2071 (0x817), region = 32  ;;  %s1710_s8 = sand.u32 (!%p1581_p8), 1, %s1489_s13  }
  0x5f   : > { %s1132_s21 = sshll.u32 (!%p1581_p8), %s1710_s8, 3  ;;  %s181_s28 = scalar_lea.sflag (!%p1581_p8), [#allocation3], %s1710_s8 }
  0x60   : > { %s184_s22 = scalar_lea.vmem (!%p1581_p8), [#allocation2], %s1132_s21  ;;  %p1866_p4 = scmp.ne.s32.totalorder (!%p1581_p8), %s1859_s18, 0 }
  0x65   : > { %1472 = dma.done.wait (%p1866_p4), %s181_s28, 128  }
  0x66   : > { %1474 = vsyncadd (%p1866_p4), %s181_s28, 4294967168  ;;  %p1867_p5 = scmp.eq.s32.totalorder %s1562_s16, 0 }
  0x68   : > { %1476 = dma.done.wait (%p1867_p5), [#allocation6], 512   ;;  %p1868_p8 = pmov %p1867_p5 }
  0x69   : > { %v1504_v0 = vmov 0.0   ;;  %vm1505_vm0 = vmmov 0   ;;  %v1321_v1 = vld [vmem:[#allocation5] sm:$0xff]   ;;  %v1322_v2 = vld [vmem:[#allocation5 + $0x8] sm:$0xff]   ;;  %v1730_v3 = vld [vmem:[%s184_s22] sm:$0xff]  ;;  %vm234_vm1 = vcmask 261120  }
  0x6a   : > { %1478 = vsyncadd (%p1868_p8), [#allocation6], 4294966784  ;;  %1180 = vmatprep.subr.bf16.mxu0 %v1504_v0  ;;  %1184 = vmatprep.mubr.msk.bf16.mxu0 %vm1505_vm0, %v1504_v0  ;;  %v217_v4 = vpack.c.bf16 %v1730_v3, %v1730_v3  ;;  %s1506_s18 = smov 64   ;;  %s1507_s20 = smov 96   ;;  %vm285_vm2 = vcmask 64512   ;;  %vm959_vm3 = vcmask 130048  }
  0x6b   : > { %1193 = vmatprep.subr.mxu1 %v1504_v0  ;;  %1195 = vmatprep.mubr.msk.f32.mxu1 %vm1505_vm0, %v1504_v0  ;;  %s1508_s17 = smov 88   ;;  %s1509_s24 = smov 120   ;;  %vm961_vm4 = vcmask 195584  }
  0x6c   : > { %1181 = vmatpush3.bf16.msra.mxu0 %v1321_v1  ;;  %s1510_s26 = smov 80   ;;  %s1511_s27 = smov 72  }
  0x6d   : > { %1182 = vmatprep.subr.bf16.mxu0 %v1504_v0  ;;  %s1512_s29 = smov 112   ;;  %s1513_s30 = smov 104  }
  0x6e   : > { %s1514_s23 = smov 56   ;;  %s1515_s5 = smov 40  }
  0x6f   : > { %s1516_s10 = smov 48   ;;  %s1517_s11 = smov 8  }
  0x70   : > { %1183 = vmatpush3.bf16.msra.mxu0 %v1322_v2  ;;  %s1518_s25 = smov 16   ;;  %s1519_s7 = smov 24  }
  0x71   : > { %1188 = vmatprep.subr.mxu0 %v1504_v0  ;;  %s1155_s28 = sshll.u32 %s1562_s16, 7  ;;  %s214_s22 = scalar_lea.vmem [#allocation8], %s1132_s21 }
  0x72   : > { %s1022_s16 = scalar_lea.sflag [#allocation4], %s1710_s8  ;;  %p1869_p0 = scmp.ne.s32.totalorder %s1864_s6, 0 }
  0x73   : > { %1185 = vmatmul.mubr.msk.bf16.vlgmr.msra.gmra.mrb[0].mxu0 %vm234_vm1, %v217_v4 }
  0x74   : > { %1190 = vmatprep.mubr.msk.f32.mxu0 %vm1505_vm0, %v1504_v0 }
 0x146   : > { %v1739_v5 = vpop.f32.mrb[0].mxu0 }
 0x147   : > { %372 = vrot.lane.b32.xlu1 %v1739_v5, %s1506_s18  ;;  %283 = vrot.lane.b32.xlu0 %v1739_v5, %s1507_s20  ;;  %v1186_v6 = vpop.f32.mrb[1].mxu0  ;;  %s1035_s18 = sshll.u32 %s214_s22, 4  ;;  %s1809_s18 = int_to_ptr.vmem [resolvable:$true] %s1035_s18 }
 0x148   : > { %v275_v7 = vpop.f32.mrb[2].mxu0  ;;  %s1427_s21 = scalar_lea.vmem %s1809_s18, 128 }
 0x149   : > { %v1187_v8 = vpop.f32.mrb[3].mxu0  ;;  %p1428_p11 = scmp.ne.s32.totalorder %s1809_s18, %s1427_s21 }
 0x14a   : > { %v1323_v8 = vld [vmem:[#allocation7] sm:$0xff]  }
 0x14b   : > { %450 = vrot.lane.b32.xlu1 %v1739_v5, %s1508_s17  ;;  %p1429_p1 = pnand %p1428_p11, %p1869_p0 }
 0x14d   : > { %p1430_p3 = pneg %p1429_p1 }
 0x14f   : > { %448 = vrot.lane.b32.xlu1 %v1739_v5, %s1509_s24  ;;  %s1807_s24 = scalar_lea.hbm %s1855_s3, %s1155_s28 }
 0x153   : > { %616 = vrot.lane.b32.xlu1 %v1739_v5, %s1510_s26  ;;  %s1520_s26 = smov [#allocation8]  }
 0x1b9   : > { %v373_v9 = vpop.permute.xlu1 %372  ;;  %v284_v10 = vpop.permute.xlu0 %283 }
 0x1ba   : > { %1189 = vmatpush3.xpose.msk.msra.mxu0 %vm285_vm2, %v284_v10  ;;  %1194 = vmatpush3.msra.mxu1 %v373_v9  ;;  %v1324_v9 = vld [vmem:[#allocation7 + $0x8] sm:$0xff]  }
 0x1bb   : > { %1198 = vmatprep.subr.mxu1 %v1504_v0  ;;  %1203 = vmatprep.subr.mxu0 %v1504_v0 }
 0x1bd   : > { %1191 = vmatmul.mubr.msk.f32.vlgmr.msra.gmra.mrb[4].mxu0 %vm285_vm2, %v1739_v5  ;;  %v451_v20 = vpop.permute.xlu1 %450 }
 0x1be   : > { %1205 = vmatprep.mubr.msk.f32.mxu0 %vm1505_vm0, %v1504_v0 }
 0x1c1   : > { %v449_v21 = vpop.permute.xlu1 %448 }
 0x1c5   : > { %v617_v22 = vpop.permute.xlu1 %616 }
 0x290   : > { %v356_v11 = vpop.f32.mrb[4].mxu0 }
 0x291   : > { %v360_v12 = vmul.f32 0.35355338, %v356_v11  ;;  %v1192_v13 = vpop.f32.mrb[5].mxu0 }
 0x293   : > { %v361_v14 = vsel %vm285_vm2, %v360_v12, -inf }
 0x294   : > { %362 = vmax.xlane.f32.xlu0 %v361_v14 }
 0x2aa   : > { %782 = vrot.lane.b32.xlu0 %v1739_v5, %s1511_s27  ;;  %s1431_s27 = sshll.u32 %s1520_s26, 4  ;;  %s1432_s27 = int_to_ptr.vmem [resolvable:$false] %s1431_s27 }
 0x2ab   : > { %p1434_p7 = scmp.lt.s32.totalorder %s1809_s18, %s1432_s27 }
 0x321   : > { %v363_v15 = vpop.xlane.xlu0 %362 }
 0x322   : > { %v364_v16 = vsub.f32 %v360_v12, %v363_v15 }
 0x324   : > { %v365_v17 = vmul.f32 1.442695, %v364_v16 }
 0x325   : > { %v783_v27 = vpop.permute.xlu0 %782 }
 0x326   : > { %1325 = vpow2.f32 %v365_v17 }
 0x330   : > { %v1326_v18 = vpop.eup %1325 }
 0x331   : > { %v367_v19 = vsel %vm285_vm2, %v1326_v18, 0.0 }
 0x332   : > { %368 = vadd.xlane.f32.xlu1 %v367_v19 }
 0x343   : > { %614 = vrot.lane.b32.xlu1 %v1739_v5, %s1512_s29  ;;  %s1433_s29 = scalar_lea.vmem %s1432_s27, 256 }
 0x344   : > { %p1435_p9 = scmp.lt.s32.totalorder %s1433_s29, %s1427_s21 }
 0x346   : > { %p1436_p12 = por %p1435_p9, %p1434_p7 }
 0x347   : > { %780 = vrot.lane.b32.xlu1 %v1739_v5, %s1513_s30 }
 0x348   : > { %p1437_p2 = pnand %p1436_p12, %p1430_p3 }
 0x3bf   : > { %v369_v23 = vpop.xlane.xlu1 %368 }
 0x3c0   : > { %1327 = vrcp.f32 %v369_v23 }
 0x3c3   : > { %v615_v26 = vpop.permute.xlu1 %614 }
 0x3c7   : > { %v781_v28 = vpop.permute.xlu1 %780 }
 0x3ca   : > { %v1328_v24 = vpop.eup %1327 }
 0x3cb   : > { %v371_v25 = vmul.f32 %v1328_v24, %v1326_v18 }
 0x3cd   : > { %1196 = vmatmul.mubr.msk.f32.vlgmr.msra.gmra.mrb[0].mxu1 %vm285_vm2, %v371_v25 }
 0x3ce   : > { %1199 = vmatpush3.xpose.msk.msra.mxu1 %vm285_vm2, %v451_v20  ;;  %1200 = vmatprep.mubr.msk.f32.mxu1 %vm1505_vm0, %v1504_v0 }
 0x3cf   : > { %1208 = vmatprep.subr.mxu1 %v1504_v0 }
 0x3d1   : > { %1201 = vmatmul.mubr.msk.f32.vlgmr.msra.gmra.mrb[2].mxu1 %vm285_vm2, %v449_v21 }
 0x3d2   : > { %1209 = vmatpush3.xpose.msk.msra.mxu1 %vm285_vm2, %v617_v22  ;;  %1210 = vmatprep.mubr.msk.f32.mxu1 %vm1505_vm0, %v1504_v0 }
 0x3d3   : > { %1218 = vmatprep.subr.mxu1 %v1504_v0 }
 0x3d5   : > { %1211 = vmatmul.mubr.msk.f32.vlgmr.msra.gmra.mrb[4].mxu1 %vm285_vm2, %v615_v26 }
 0x3d6   : > { %1219 = vmatpush3.xpose.msk.msra.mxu1 %vm285_vm2, %v783_v27  ;;  %1220 = vmatprep.mubr.msk.f32.mxu1 %vm1505_vm0, %v1504_v0 }
 0x3d7   : > { %1228 = vmatprep.subr.bf16.mxu1 %v1504_v0 }
 0x3d9   : > { %1221 = vmatmul.mubr.msk.f32.vlgmr.msra.gmra.mrb[6].mxu1 %vm285_vm2, %v781_v28 }
 0x3da   : > { %1232 = vmatprep.mubr.msk.bf16.mxu1 %vm1505_vm0, %v1504_v0  ;;  %1229 = vmatpush3.bf16.msra.mxu1 %v1323_v8 }
 0x3db   : > { %1230 = vmatprep.subr.bf16.mxu1 %v1504_v0 }
 0x3de   : > { %1231 = vmatpush3.bf16.msra.mxu1 %v1324_v9 }
 0x4a0   : > { %v1776_v29 = vpop.f32.mrb[0].mxu1 }
 0x4a1   : > { %v1197_v30 = vpop.f32.mrb[1].mxu1 }
 0x4a4   : > { %v522_v31 = vpop.f32.mrb[2].mxu1 }
 0x4a5   : > { %v526_v32 = vmul.f32 0.35355338, %v522_v31  ;;  %v1202_v33 = vpop.f32.mrb[3].mxu1 }
 0x4a7   : > { %v527_v34 = vsel %vm285_vm2, %v526_v32, -inf }
 0x4a8   : > { %528 = vmax.xlane.f32.xlu1 %v527_v34  ;;  %v688_v35 = vpop.f32.mrb[4].mxu1 }
 0x4a9   : > { %v692_v36 = vmul.f32 0.35355338, %v688_v35  ;;  %v1212_v37 = vpop.f32.mrb[5].mxu1 }
 0x4ab   : > { %v693_v38 = vsel %vm285_vm2, %v692_v36, -inf }
 0x4ac   : > { %694 = vmax.xlane.f32.xlu0 %v693_v38  ;;  %v854_v39 = vpop.f32.mrb[6].mxu1 }
 0x4ad   : > { %v858_v40 = vmul.f32 0.35355338, %v854_v39  ;;  %v1222_v41 = vpop.f32.mrb[7].mxu1 }
 0x4af   : > { %v859_v42 = vsel %vm285_vm2, %v858_v40, -inf }
 0x4b0   : > { %860 = vmax.xlane.f32.xlu1 %v859_v42 }
 0x4c1   : > { %538 = vrot.lane.b32.xlu1 %v1739_v5, %s1514_s23 }
 0x535   : > { %v529_v43 = vpop.xlane.xlu1 %528 }
 0x536   : > { %v530_v44 = vsub.f32 %v526_v32, %v529_v43 }
 0x538   : > { %v531_v45 = vmul.f32 1.442695, %v530_v44 }
 0x539   : > { %v695_v46 = vpop.xlane.xlu0 %694 }
 0x53a   : > { %1329 = vpow2.f32 %v531_v45  ;;  %v696_v47 = vsub.f32 %v692_v36, %v695_v46 }
 0x53c   : > { %v697_v48 = vmul.f32 1.442695, %v696_v47 }
 0x53d   : > { %v861_v49 = vpop.xlane.xlu1 %860 }
 0x53e   : > { %1331 = vpow2.f32 %v697_v48  ;;  %v862_v50 = vsub.f32 %v858_v40, %v861_v49 }
 0x540   : > { %v863_v51 = vmul.f32 1.442695, %v862_v50 }
 0x541   : > { %v539_v52 = vpop.permute.xlu1 %538 }
 0x542   : > { %1333 = vpow2.f32 %v863_v51  ;;  %1204 = vmatpush3.msra.mxu0 %v539_v52 }
 0x543   : > { %1213 = vmatprep.subr.mxu0 %v1504_v0 }
 0x544   : > { %v1330_v53 = vpop.eup %1329 }
 0x545   : > { %v533_v54 = vsel %vm285_vm2, %v1330_v53, 0.0 }
 0x546   : > { %534 = vadd.xlane.f32.xlu1 %v533_v54 }
 0x548   : > { %v1332_v55 = vpop.eup %1331 }
 0x549   : > { %v699_v56 = vsel %vm285_vm2, %v1332_v55, 0.0 }
 0x54a   : > { %700 = vadd.xlane.f32.xlu1 %v699_v56 }
 0x54c   : > { %v1334_v57 = vpop.eup %1333 }
 0x54d   : > { %v865_v58 = vsel %vm285_vm2, %v1334_v57, 0.0 }
 0x54e   : > { %866 = vadd.xlane.f32.xlu0 %v865_v58 }
 0x55b   : > { %870 = vrot.lane.b32.xlu1 %v1739_v5, %s1515_s5 }
 0x564   : > { %704 = vrot.lane.b32.xlu0 %v1739_v5, %s1516_s10 }
 0x5d3   : > { %v535_v59 = vpop.xlane.xlu1 %534 }
 0x5d4   : > { %1335 = vrcp.f32 %v535_v59 }
 0x5d7   : > { %v701_v60 = vpop.xlane.xlu1 %700 }
 0x5d8   : > { %1337 = vrcp.f32 %v701_v60 }
 0x5db   : > { %v867_v61 = vpop.xlane.xlu0 %866  ;;  %v871_v5 = vpop.permute.xlu1 %870 }
 0x5dc   : > { %1339 = vrcp.f32 %v867_v61 }
 0x5de   : > { %v1336_v62 = vpop.eup %1335 }
 0x5df   : > { %v537_v63 = vmul.f32 %v1336_v62, %v1330_v53  ;;  %v705_v1 = vpop.permute.xlu0 %704 }
 0x5e1   : > { %1206 = vmatmul.mubr.msk.f32.vlgmr.msra.gmra.mrb[6].mxu0 %vm285_vm2, %v537_v63 }
 0x5e2   : > { %v1338_v2 = vpop.eup %1337  ;;  %1214 = vmatpush3.msra.mxu0 %v705_v1  ;;  %1215 = vmatprep.mubr.msk.f32.mxu0 %vm1505_vm0, %v1504_v0 }
 0x5e3   : > { %v703_v4 = vmul.f32 %v1338_v2, %v1332_v55  ;;  %1223 = vmatprep.subr.mxu0 %v1504_v0 }
 0x5e5   : > { %1216 = vmatmul.mubr.msk.f32.vlgmr.msra.gmra.mrb[8].mxu0 %vm285_vm2, %v703_v4 }
 0x5e6   : > { %v1340_v6 = vpop.eup %1339  ;;  %1224 = vmatpush3.msra.mxu0 %v871_v5  ;;  %1225 = vmatprep.mubr.msk.f32.mxu0 %vm1505_vm0, %v1504_v0 }
 0x5e7   : > { %v869_v7 = vmul.f32 %v1340_v6, %v1334_v57 }
 0x5e9   : > { %1226 = vmatmul.mubr.msk.f32.vlgmr.msra.gmra.mrb[10].mxu0 %vm285_vm2, %v869_v7 }
 0x6b4   : > { %v610_v10 = vpop.f32.mrb[6].mxu0 }
 0x6b5   : > { %947 = vrot.lane.b32.xlu1 %v610_v10, %s1517_s11  ;;  %v1207_v11 = vpop.f32.mrb[7].mxu0 }
 0x6b8   : > { %v776_v12 = vpop.f32.mrb[8].mxu0 }
 0x6b9   : > { %951 = vrot.lane.b32.xlu0 %v776_v12, %s1518_s25  ;;  %v1217_v13 = vpop.f32.mrb[9].mxu0 }
 0x6bc   : > { %v942_v14 = vpop.f32.mrb[10].mxu0 }
 0x6bd   : > { %955 = vrot.lane.b32.xlu1 %v942_v14, %s1519_s7  ;;  %v1227_v15 = vpop.f32.mrb[11].mxu0 }
 0x727   : > { %v948_v16 = vpop.permute.xlu1 %947 }
 0x728   : > { %v958_v0 = vsel %vm285_vm2, %v1776_v29, %v948_v16 }
 0x72b   : > { %v952_v17 = vpop.permute.xlu0 %951 }
 0x72c   : > { %v960_v18 = vsel %vm959_vm3, %v958_v0, %v952_v17 }
 0x72f   : > { %v956_v19 = vpop.permute.xlu1 %955 }
 0x730   : > { %v962_v20 = vsel %vm961_vm4, %v960_v18, %v956_v19 }
 0x731   : > { %v963_v21 = vpack.c.bf16 %v962_v20, %v962_v20 }
 0x733   : > { %1233 = vmatmul.mubr.msk.bf16.vlgmr.msra.gmra.mrb[8].mxu1 %vm234_vm1, %v963_v21 }
 0x806   : > { %v1013_v22 = vpop.f32.mrb[8].mxu1 }
 0x807   : > { %v1019_v23 = vadd.f32 %v1013_v22, %v1730_v3  ;;  %v1234_v24 = vpop.f32.mrb[9].mxu1 }
 0x808   : > { %v1016_v25 = vpop.f32.mrb[10].mxu1 }
 0x809   : > { %v1235_v26 = vpop.f32.mrb[11].mxu1  ;;  %1020 = vst.msk [vmem:[%s214_s22] sm:$0xff] %vm234_vm1, %v1019_v23 }
 0x80a   : > { %1440 = shalt.err (!%p1437_p2)
}
 0x80b   : > { %s1441_s8 = scalar_lea.hbm %s1807_s24, 128  ;;  %s1445_s5 = scalar_lea.hbm %s1855_s3, 256 }
 0x80c   : > { %p1442_p13 = scmp.ne.s32.totalorder %s1807_s24, %s1441_s8  ;;  %p1446_p4 = scmp.lt.u32.totalorder %s1807_s24, %s1855_s3 }
 0x80d   : > { %p1447_p5 = scmp.lt.u32.totalorder %s1445_s5, %s1441_s8  ;;  %p1449_p11 = scmp.lt.u32.totalorder %s1441_s8, %s1807_s24 }
 0x80e   : > { %p1443_p6 = pnand %p1442_p13, %p1869_p0 }
 0x80f   : > { %p1448_p8 = por %p1447_p5, %p1446_p4 }
 0x810   : > { %p1444_p10 = pneg %p1443_p6 }
 0x811   : > { %p1450_p1 = por %p1449_p11, %p1448_p8 }
 0x813   : > { %p1451_p3 = pnand %p1450_p1, %p1444_p10 }
 0x815   : > { %1454 = shalt.err (!%p1451_p3)
}
 0x816   : > { %1246 = dma.vmem_to_hbm [thread:$0]  (%p1869_p0), %s1809_s18, 128, %s1807_s24, %s1022_s16  }
 0x817 PF: > { %s1047_s25 = sand.u32 1, %s1485_s12   ;;  %p1870_p7 = scmp.ne.s32.totalorder %s1860_s19, 0 }
 0x818   : > { %p1871_p9 = scmp.ge.s32.totalorder %s1497_s15, 2  ;;  %s1048_s7 = scalar_lea.sflag [#allocation4], %s1047_s25 }
 0x81a   : > { %p1260_p12 = pnand %p1871_p9, %p1870_p7 }
 0x81c   : > { %1480 = dma.done.wait (!%p1260_p12), %s1048_s7, 128  }
 0x81d   : > { %1482 = vsyncadd (!%p1260_p12), %s1048_s7, 4294967168  ;;  %p17_p2 = scmp.ge.s32.totalorder %s1651_s4, 4   ;;  %s1872_s12 = smov %s1489_s13 }
 0x81e   : > { %s1873_s13 = smov %s1493_s14  ;;  %s1874_s14 = smov %s1667_s9 }
 0x81f   : > { %s1875_s15 = smov %s1651_s4  ;;  %19 = sbr.rel (!%p17_p2) target bundleno = 6 (0x6), region = 85 }
 0x826   :  { %1053 = vsyncpa [#allocation3], 1 }
 0x827   :  { %1055 = vsyncpa [#allocation3 + $0x1], 1 }
 0x828   :  { %1056 = vsyncpa [#allocation6], 1 }
 0x829   :  { %1057 = vsyncpa [#allocation4], 1 }
 0x82a   :  { %1059 = vsyncpa [#allocation4 + $0x1], 1 }

</bundles_post_ra>
